<compile_context>
chip_gen: v5e
topology: v5e:2x2
jax: 0.10.0
libtpu: 0.0.40
codegen_flags: <defaults>
</compile_context>

<pallas_src>
import functools
import math

import jax
import jax.numpy as jnp
from jax.experimental import pallas as pl
from jax.experimental.pallas import tpu as pltpu


# --- narrow capability probe: single-buffered (grid-invariant) weight specs --
def _buffered_supported():
    if not hasattr(pl, "Buffered"):
        return False
    try:
        pl.BlockSpec((8, 128), lambda i, j: (0, 0), pipeline_mode=pl.Buffered(1))
    except TypeError:
        return False
    return True


_HAS_BUFFERED = _buffered_supported()


def _attn_prop_kernel(x_ref, kt_ref, v_ref,
                      wq_ref, bq_ref, wm_ref, bm_ref,
                      w1x_ref, w1m_ref, b1_ref, w2_ref, b2_ref,
                      o_ref, attn_ref, *, num_heads):
    """One (batch, query-tile) step of AttentionalPropagation.forward."""
    x = x_ref[0]          # (tile_n, F)  bf16, channels-last
    kt = kt_ref[0]        # (F, M)       bf16, pre-projected K^T, head-contiguous rows
    v = v_ref[0]          # (M, F)       bf16, pre-projected V,   head-contiguous cols
    f = x.shape[-1]
    d = f // num_heads

    # Q projection; 1/sqrt(d) is already folded into wq/bq by the wrapper.
    q = jnp.dot(x, wq_ref[...], preferred_element_type=jnp.float32) + bq_ref[...]
    q16 = q.astype(jnp.bfloat16)

    # Per-head attention.  Each head's (un-normalized) e@V, scaled by 1/l, is
    # written straight into a (tile_n, F) VMEM scratch slab at its static
    # column slice, so head outputs never pile up in vregs and the merge is a
    # single lane-dense (tile_n,F)@(F,F) matmul.
    for h in range(num_heads):
        lo = h * d
        qh = q16[:, lo:lo + d]                       # (tile_n, d)
        kh_t = kt[lo:lo + d, :]                      # (d, M) -- already transposed
        vh = v[:, lo:lo + d]                         # (M, d)
        sc = jnp.dot(qh, kh_t, preferred_element_type=jnp.float32)   # (tile_n, M)
        sc = sc - jnp.max(sc, axis=-1, keepdims=True)                # f32 softmax math
        e = jnp.exp(sc)
        l = jnp.sum(e, axis=-1, keepdims=True)                       # (tile_n, 1)
        pv = jnp.dot(e.astype(jnp.bfloat16), vh,
                     preferred_element_type=jnp.float32)             # un-normalized PV
        attn_ref[:, lo:lo + d] = (pv * pl.reciprocal(l, approx=False)
                                  ).astype(attn_ref.dtype)

    msg = jnp.dot(attn_ref[...], wm_ref[...],
                  preferred_element_type=jnp.float32) + bm_ref[...]

    # MLP([2F, 2F, F]) on cat([x, message]); BatchNorm folded into w1x/w1m/b1.
    # TODO(synk): training-mode BatchNorm (batch statistics over B*N) would need
    # a cross-grid reduction; inference-mode running-stats semantics are used.
    y = (jnp.dot(x, w1x_ref[...], preferred_element_type=jnp.float32)
         + jnp.dot(msg.astype(jnp.bfloat16), w1m_ref[...],
                   preferred_element_type=jnp.float32)
         + b1_ref[...])
    y = jnp.maximum(y, 0.0)
    out = (jnp.dot(y.astype(jnp.bfloat16), w2_ref[...],
                   preferred_element_type=jnp.float32) + b2_ref[...])
    o_ref[0] = out.astype(o_ref.dtype)


def _pallas_forward(x_nf, kt_fm, v_mf, consts, *, num_heads, tile_n, cost,
                    out_dtype):
    b, n, f = x_nf.shape
    m = v_mf.shape[1]
    n_tiles = pl.cdiv(n, tile_n)

    def const_spec(c):
        # All weights/biases are 2-D and grid-invariant -> single buffering.
        if _HAS_BUFFERED:
            return pl.BlockSpec(c.shape, lambda bi, qi: (0, 0),
                                pipeline_mode=pl.Buffered(1))
        return pl.BlockSpec(c.shape, lambda bi, qi: (0, 0))

    in_specs = [
        pl.BlockSpec((1, tile_n, f), lambda bi, qi: (bi, qi, 0)),   # x query tile
        pl.BlockSpec((1, f, m), lambda bi, qi: (bi, 0, 0)),         # K^T (per batch)
        pl.BlockSpec((1, m, f), lambda bi, qi: (bi, 0, 0)),         # V   (per batch)
    ] + [const_spec(c) for c in consts]

    return pl.pallas_call(
        functools.partial(_attn_prop_kernel, num_heads=num_heads),
        out_shape=jax.ShapeDtypeStruct((b, n, f), out_dtype),
        grid=(b, n_tiles),
        in_specs=in_specs,
        out_specs=pl.BlockSpec((1, tile_n, f), lambda bi, qi: (bi, qi, 0)),
        scratch_shapes=[pltpu.VMEM((tile_n, f), jnp.bfloat16)],
        compiler_params=pltpu.CompilerParams(
            dimension_semantics=("parallel", "parallel"),
            vmem_limit_bytes=48 * 1024 * 1024),
        cost_estimate=cost,
    )(x_nf, kt_fm, v_mf, *consts)


def init_params(key, feature_dim):
    f = feature_dim
    ks = jax.random.split(key, 12)

    def w(k, shape):
        return 0.1 * jax.random.normal(k, shape, jnp.float32)

    return dict(
        wq=w(ks[0], (f, f)), bq=w(ks[1], (f,)),      # proj[0]  Conv1d(F, F, 1)
        wk=w(ks[2], (f, f)), bk=w(ks[3], (f,)),      # proj[1]
        wv=w(ks[4], (f, f)), bv=w(ks[5], (f,)),      # proj[2]
        wm=w(ks[6], (f, f)), bm=w(ks[7], (f,)),      # merge    Conv1d(F, F, 1)
        w1=w(ks[8], (2 * f, 2 * f)), b1=w(ks[9], (2 * f,)),   # mlp Conv1d(2F,2F,1)
        bn_gamma=jnp.ones((2 * f,), jnp.float32),    # BatchNorm1d(2F) defaults
        bn_beta=jnp.zeros((2 * f,), jnp.float32),
        bn_mean=jnp.zeros((2 * f,), jnp.float32),
        bn_var=jnp.ones((2 * f,), jnp.float32),
        w2=w(ks[10], (f, 2 * f)),
        b2=jnp.zeros((f,), jnp.float32),             # nn.init.constant_(mlp[-1].bias, 0)
    )


def _pick_tile_n(n, tile_n):
    if tile_n >= n:
        return n
    t = (tile_n // 128) * 128                # lane/MXU-aligned tiles when possible
    if t == 0:
        t = max(16, (tile_n // 16) * 16)     # never below 16 (bf16 sublane packing)
    return min(t, n)


def attentional_propagation(x, source, params, num_heads, eps=1e-5, tile_n=256,
                            out_dtype=jnp.float32):
    """x: (B, F, N), source: (B, F, M)  (PyTorch NCL) -> (B, F, N)."""
    b, f, n = x.shape
    m = source.shape[2]
    assert f % num_heads == 0
    d = f // num_heads
    inv_sqrt_d = 1.0 / math.sqrt(d)
    bf16 = jnp.bfloat16

    tile_n = _pick_tile_n(n, tile_n)

    # ---- glue: permute Conv1d weights so heads are contiguous -------------
    # torch view(B, d, H, L): channel c = d_idx*H + h; we want col j = h*d + d_idx.
    def perm_out(wmat):                       # (out,in) -> (in, out-permuted)
        return jnp.transpose(wmat.T.reshape(f, d, num_heads), (0, 2, 1)).reshape(f, f)

    def perm_bias(bvec):
        return bvec.reshape(d, num_heads).T.reshape(1, f)

    # Q projection stays in-kernel; 1/sqrt(d) folded into wq/bq (f32 math, then cast).
    wq = (perm_out(params['wq']) * inv_sqrt_d).astype(bf16)
    bq = perm_bias(params['bq']) * inv_sqrt_d
    # merge conv: permute rows of wm.T to match head-contiguous attention layout
    wm = jnp.transpose(params['wm'].T.reshape(d, num_heads, f),
                       (1, 0, 2)).reshape(f, f).astype(bf16)
    bm = params['bm'].reshape(1, f)

    # MLP layer 1 split by input-channel halves, BatchNorm folded in (inference).
    bns = params['bn_gamma'] / jnp.sqrt(params['bn_var'] + eps)
    bnb = params['bn_beta'] - params['bn_mean'] * bns
    w1 = params['w1']
    w1x = (w1[:, :f].T * bns[None, :]).astype(bf16)        # acts on x    (F, 2F)
    w1m = (w1[:, f:].T * bns[None, :]).astype(bf16)        # acts on msg  (F, 2F)
    b1f = (params['b1'] * bns + bnb).reshape(1, 2 * f)
    w2 = params['w2'].T.astype(bf16)                       # (2F, F)
    b2 = params['b2'].reshape(1, f)

    x_nf = jnp.transpose(x, (0, 2, 1)).astype(bf16)        # (B, N, F)
    s_mf = jnp.transpose(source, (0, 2, 1)).astype(bf16)   # (B, M, F)

    # ---- K/V projections hoisted out of the query-tile loop ---------------
    # (review: compute once per batch, not once per query tile.)
    wk = perm_out(params['wk']).astype(bf16)
    wv = perm_out(params['wv']).astype(bf16)
    bv = perm_bias(params['bv'])                           # (1, F) f32
    # bk dropped: q·bk is constant across the key axis -> softmax-invariant.
    k_proj = jnp.einsum('bmf,fg->bmg', s_mf, wk,
                        preferred_element_type=jnp.float32)            # (B, M, F)
    kt_fm = jnp.transpose(k_proj, (0, 2, 1)).astype(bf16)               # (B, F, M)
    v_mf = (jnp.einsum('bmf,fg->bmg', s_mf, wv,
                       preferred_element_type=jnp.float32)
            + bv[None]).astype(bf16)                                    # (B, M, F)

    consts = [wq, bq, wm, bm, w1x, w1m, b1f, w2, b2]

    # cost of the pallas_call only (K/V projections now live outside it)
    flops = int(b * n * (16 * f * f + 4 * m * f))
    transc = int(b * num_heads * n * (m + 1))
    out_b = jnp.dtype(out_dtype).itemsize
    byt = int(b * (2 * n * f + 4 * m * f + out_b * n * f) + 16 * f * f + 20 * f)
    cost = pl.CostEstimate(flops=flops, transcendentals=transc,
                           bytes_accessed=byt)

    out = _pallas_forward(x_nf, kt_fm, v_mf, consts, num_heads=num_heads,
                          tile_n=tile_n, cost=cost, out_dtype=out_dtype)

    return jnp.transpose(out, (0, 2, 1))       # back to (B, F, N)


def reference(x, source, params, num_heads, eps=1e-5):
    """Plain-JAX transcription of the PyTorch forward (for verification)."""
    b, f, _ = x.shape
    d = f // num_heads

    def conv1d(wmat, bias, t):                 # t: (B, C, L)
        return jnp.einsum('oc,bcl->bol', wmat, t) + bias[None, :, None]

    q = conv1d(params['wq'], params['bq'], x).reshape(b, d, num_heads, -1)
    k = conv1d(params['wk'], params['bk'], source).reshape(b, d, num_heads, -1)
    v = conv1d(params['wv'], params['bv'], source).reshape(b, d, num_heads, -1)
    scores = jnp.einsum('bdhn,bdhm->bhnm', q, k) / math.sqrt(d)
    prob = jax.nn.softmax(scores, axis=-1)
    attn_out = jnp.einsum('bhnm,bdhm->bdhn', prob, v)
    message = conv1d(params['wm'], params['bm'], attn_out.reshape(b, f, -1))
    h = jnp.concatenate([x, message], axis=1)
    h = conv1d(params['w1'], params['b1'], h)
    h = ((h - params['bn_mean'][None, :, None])
         / jnp.sqrt(params['bn_var'][None, :, None] + eps)
         * params['bn_gamma'][None, :, None] + params['bn_beta'][None, :, None])
    h = jnp.maximum(h, 0.0)
    return conv1d(params['w2'], params['b2'], h)


if __name__ == "__main__":
    B, F, H, N, M = 2, 32, 4, 32, 16           # feature_dim=32, num_heads=4
    key = jax.random.PRNGKey(0)
    kx, ks, kp = jax.random.split(key, 3)
    x = jax.random.normal(kx, (B, F, N), jnp.float32)       # (B, C, L) like torch
    source = jax.random.normal(ks, (B, F, M), jnp.float32)
    params = init_params(kp, F)

    # tile_n=16 exercises the query-tiling grid axis: grid = (B, N // 16) = (2, 2).
    out = jax.block_until_ready(
        attentional_propagation(x, source, params, H, tile_n=16))
    ref = reference(x, source, params, H)
    assert out.shape == (B, F, N), out.shape
    max_err = float(jnp.max(jnp.abs(out - ref)))
    # bf16 MXU operands with f32 accumulation -> loose-but-intentional tolerance.
    assert jnp.allclose(out, ref, atol=3e-2, rtol=3e-2), max_err
    print("KERNEL_OK")
</pallas_src>

<mosaic_0001>
module attributes {stable_mosaic.version = 11 : i64} {
  func.func @_attn_prop_kernel(%arg0: i32, %arg1: i32, %arg2: memref<1x16x32xbf16, #tpu.memory_space<vmem>>, %arg3: memref<1x32x16xbf16, #tpu.memory_space<vmem>>, %arg4: memref<1x16x32xbf16, #tpu.memory_space<vmem>>, %arg5: memref<32x32xbf16, #tpu.memory_space<vmem>>, %arg6: memref<1x32xf32, #tpu.memory_space<vmem>>, %arg7: memref<32x32xbf16, #tpu.memory_space<vmem>>, %arg8: memref<1x32xf32, #tpu.memory_space<vmem>>, %arg9: memref<32x64xbf16, #tpu.memory_space<vmem>>, %arg10: memref<32x64xbf16, #tpu.memory_space<vmem>>, %arg11: memref<1x64xf32, #tpu.memory_space<vmem>>, %arg12: memref<64x32xbf16, #tpu.memory_space<vmem>>, %arg13: memref<1x32xf32, #tpu.memory_space<vmem>>, %arg14: memref<1x16x32xf32, #tpu.memory_space<vmem>>, %arg15: memref<16x32xbf16, #tpu.memory_space<vmem>>) attributes {dimension_semantics = [#tpu.dimension_semantics<parallel>, #tpu.dimension_semantics<parallel>], iteration_bounds = array<i64: 2, 2>, scalar_prefetch = 0 : i64, scratch_operands = 1 : i64, tpu.core_type = #tpu.core_type<tc>, window_params = [{transform_indices = @transform_0, window_bounds = array<i64: 1, 16, 32>}, {transform_indices = @transform_1, window_bounds = array<i64: 1, 32, 16>}, {transform_indices = @transform_2, window_bounds = array<i64: 1, 16, 32>}, {pipeline_mode = #tpu.pipeline_mode<synchronous>, transform_indices = @transform_3, window_bounds = array<i64: 32, 32>}, {pipeline_mode = #tpu.pipeline_mode<synchronous>, transform_indices = @transform_4, window_bounds = array<i64: 1, 32>}, {pipeline_mode = #tpu.pipeline_mode<synchronous>, transform_indices = @transform_5, window_bounds = array<i64: 32, 32>}, {pipeline_mode = #tpu.pipeline_mode<synchronous>, transform_indices = @transform_6, window_bounds = array<i64: 1, 32>}, {pipeline_mode = #tpu.pipeline_mode<synchronous>, transform_indices = @transform_7, window_bounds = array<i64: 32, 64>}, {pipeline_mode = #tpu.pipeline_mode<synchronous>, transform_indices = @transform_8, window_bounds = array<i64: 32, 64>}, {pipeline_mode = #tpu.pipeline_mode<synchronous>, transform_indices = @transform_9, window_bounds = array<i64: 1, 64>}, {pipeline_mode = #tpu.pipeline_mode<synchronous>, transform_indices = @transform_10, window_bounds = array<i64: 64, 32>}, {pipeline_mode = #tpu.pipeline_mode<synchronous>, transform_indices = @transform_11, window_bounds = array<i64: 1, 32>}, {transform_indices = @transform_12, window_bounds = array<i64: 1, 16, 32>}]} {
    %c0 = arith.constant 0 : index
    %c0_0 = arith.constant 0 : index
    %c0_1 = arith.constant 0 : index
    %0 = vector.load %arg2[%c0, %c0_0, %c0_1] : memref<1x16x32xbf16, #tpu.memory_space<vmem>>, vector<1x16x32xbf16>
    %1 = vector.shape_cast %0 : vector<1x16x32xbf16> to vector<16x32xbf16>
    %c0_2 = arith.constant 0 : index
    %c0_3 = arith.constant 0 : index
    %c0_4 = arith.constant 0 : index
    %2 = vector.load %arg3[%c0_2, %c0_3, %c0_4] : memref<1x32x16xbf16, #tpu.memory_space<vmem>>, vector<1x32x16xbf16>
    %3 = vector.shape_cast %2 : vector<1x32x16xbf16> to vector<32x16xbf16>
    %c0_5 = arith.constant 0 : index
    %c0_6 = arith.constant 0 : index
    %c0_7 = arith.constant 0 : index
    %4 = vector.load %arg4[%c0_5, %c0_6, %c0_7] : memref<1x16x32xbf16, #tpu.memory_space<vmem>>, vector<1x16x32xbf16>
    %5 = vector.shape_cast %4 : vector<1x16x32xbf16> to vector<16x32xbf16>
    %c0_8 = arith.constant 0 : index
    %c0_9 = arith.constant 0 : index
    %6 = vector.load %arg5[%c0_8, %c0_9] : memref<32x32xbf16, #tpu.memory_space<vmem>>, vector<32x32xbf16>
    %cst = arith.constant dense<0.000000e+00> : vector<16x32xf32>
    %7 = tpu.matmul %1, %6, %cst {dimension_numbers = #tpu.dot_dimension_numbers<[1], [0], [0], [1], [0, 0, 1, 1], [], []>} : vector<16x32xbf16>, vector<32x32xbf16>, vector<16x32xf32> -> vector<16x32xf32>
    %c0_10 = arith.constant 0 : index
    %c0_11 = arith.constant 0 : index
    %8 = vector.load %arg6[%c0_10, %c0_11] : memref<1x32xf32, #tpu.memory_space<vmem>>, vector<1x32xf32>
    %9 = vector.broadcast %8 : vector<1x32xf32> to vector<16x32xf32>
    %10 = arith.addf %7, %9 : vector<16x32xf32>
    %11 = arith.truncf %10 : vector<16x32xf32> to vector<16x32xbf16>
    %12 = vector.extract_strided_slice %11 {offsets = [0, 0], sizes = [16, 8], strides = [1, 1]} : vector<16x32xbf16> to vector<16x8xbf16>
    %13 = vector.extract_strided_slice %3 {offsets = [0, 0], sizes = [8, 16], strides = [1, 1]} : vector<32x16xbf16> to vector<8x16xbf16>
    %14 = vector.extract_strided_slice %5 {offsets = [0, 0], sizes = [16, 8], strides = [1, 1]} : vector<16x32xbf16> to vector<16x8xbf16>
    %cst_12 = arith.constant dense<0.000000e+00> : vector<16x16xf32>
    %15 = tpu.matmul %12, %13, %cst_12 {dimension_numbers = #tpu.dot_dimension_numbers<[1], [0], [0], [1], [0, 0, 1, 1], [], []>} : vector<16x8xbf16>, vector<8x16xbf16>, vector<16x16xf32> -> vector<16x16xf32>
    %cst_13 = arith.constant dense<0xFF800000> : vector<16xf32>
    %16 = vector.multi_reduction <maximumf>, %15, %cst_13 [1] : vector<16x16xf32> to vector<16xf32>
    %17 = vector.shape_cast %16 : vector<16xf32> to vector<16x1xf32>
    %18 = vector.broadcast %17 : vector<16x1xf32> to vector<16x16xf32>
    %19 = arith.subf %15, %18 : vector<16x16xf32>
    %20 = math.exp %19 : vector<16x16xf32>
    %cst_14 = arith.constant dense<0.000000e+00> : vector<16xf32>
    %21 = vector.multi_reduction <add>, %20, %cst_14 [1] : vector<16x16xf32> to vector<16xf32>
    %22 = vector.shape_cast %21 : vector<16xf32> to vector<16x1xf32>
    %23 = arith.truncf %20 : vector<16x16xf32> to vector<16x16xbf16>
    %cst_15 = arith.constant dense<0.000000e+00> : vector<16x8xf32>
    %24 = tpu.matmul %23, %14, %cst_15 {dimension_numbers = #tpu.dot_dimension_numbers<[1], [0], [0], [1], [0, 0, 1, 1], [], []>} : vector<16x16xbf16>, vector<16x8xbf16>, vector<16x8xf32> -> vector<16x8xf32>
    %25 = tpu.reciprocal %22 : vector<16x1xf32> -> vector<16x1xf32>
    %26 = vector.broadcast %25 : vector<16x1xf32> to vector<16x8xf32>
    %27 = arith.mulf %24, %26 : vector<16x8xf32>
    %28 = arith.truncf %27 : vector<16x8xf32> to vector<16x8xbf16>
    %c0_16 = arith.constant 0 : index
    %c0_17 = arith.constant 0 : index
    %29 = vector.load %arg15[%c0_16, %c0_17] : memref<16x32xbf16, #tpu.memory_space<vmem>>, vector<16x8xbf16>
    tpu.vector_store %arg15[%c0_16, %c0_17], %28 {strides = array<i32>} : memref<16x32xbf16, #tpu.memory_space<vmem>>, vector<16x8xbf16>,
    %30 = vector.extract_strided_slice %11 {offsets = [0, 8], sizes = [16, 8], strides = [1, 1]} : vector<16x32xbf16> to vector<16x8xbf16>
    %31 = vector.extract_strided_slice %3 {offsets = [8, 0], sizes = [8, 16], strides = [1, 1]} : vector<32x16xbf16> to vector<8x16xbf16>
    %32 = vector.extract_strided_slice %5 {offsets = [0, 8], sizes = [16, 8], strides = [1, 1]} : vector<16x32xbf16> to vector<16x8xbf16>
    %cst_18 = arith.constant dense<0.000000e+00> : vector<16x16xf32>
    %33 = tpu.matmul %30, %31, %cst_18 {dimension_numbers = #tpu.dot_dimension_numbers<[1], [0], [0], [1], [0, 0, 1, 1], [], []>} : vector<16x8xbf16>, vector<8x16xbf16>, vector<16x16xf32> -> vector<16x16xf32>
    %cst_19 = arith.constant dense<0xFF800000> : vector<16xf32>
    %34 = vector.multi_reduction <maximumf>, %33, %cst_19 [1] : vector<16x16xf32> to vector<16xf32>
    %35 = vector.shape_cast %34 : vector<16xf32> to vector<16x1xf32>
    %36 = vector.broadcast %35 : vector<16x1xf32> to vector<16x16xf32>
    %37 = arith.subf %33, %36 : vector<16x16xf32>
    %38 = math.exp %37 : vector<16x16xf32>
    %cst_20 = arith.constant dense<0.000000e+00> : vector<16xf32>
    %39 = vector.multi_reduction <add>, %38, %cst_20 [1] : vector<16x16xf32> to vector<16xf32>
    %40 = vector.shape_cast %39 : vector<16xf32> to vector<16x1xf32>
    %41 = arith.truncf %38 : vector<16x16xf32> to vector<16x16xbf16>
    %cst_21 = arith.constant dense<0.000000e+00> : vector<16x8xf32>
    %42 = tpu.matmul %41, %32, %cst_21 {dimension_numbers = #tpu.dot_dimension_numbers<[1], [0], [0], [1], [0, 0, 1, 1], [], []>} : vector<16x16xbf16>, vector<16x8xbf16>, vector<16x8xf32> -> vector<16x8xf32>
    %43 = tpu.reciprocal %40 : vector<16x1xf32> -> vector<16x1xf32>
    %44 = vector.broadcast %43 : vector<16x1xf32> to vector<16x8xf32>
    %45 = arith.mulf %42, %44 : vector<16x8xf32>
    %46 = arith.truncf %45 : vector<16x8xf32> to vector<16x8xbf16>
    %c0_22 = arith.constant 0 : index
    %c8 = arith.constant 8 : index
    %47 = vector.load %arg15[%c0_22, %c8] : memref<16x32xbf16, #tpu.memory_space<vmem>>, vector<16x8xbf16>
    tpu.vector_store %arg15[%c0_22, %c8], %46 {strides = array<i32>} : memref<16x32xbf16, #tpu.memory_space<vmem>>, vector<16x8xbf16>,
    %48 = vector.extract_strided_slice %11 {offsets = [0, 16], sizes = [16, 8], strides = [1, 1]} : vector<16x32xbf16> to vector<16x8xbf16>
    %49 = vector.extract_strided_slice %3 {offsets = [16, 0], sizes = [8, 16], strides = [1, 1]} : vector<32x16xbf16> to vector<8x16xbf16>
    %50 = vector.extract_strided_slice %5 {offsets = [0, 16], sizes = [16, 8], strides = [1, 1]} : vector<16x32xbf16> to vector<16x8xbf16>
    %cst_23 = arith.constant dense<0.000000e+00> : vector<16x16xf32>
    %51 = tpu.matmul %48, %49, %cst_23 {dimension_numbers = #tpu.dot_dimension_numbers<[1], [0], [0], [1], [0, 0, 1, 1], [], []>} : vector<16x8xbf16>, vector<8x16xbf16>, vector<16x16xf32> -> vector<16x16xf32>
    %cst_24 = arith.constant dense<0xFF800000> : vector<16xf32>
    %52 = vector.multi_reduction <maximumf>, %51, %cst_24 [1] : vector<16x16xf32> to vector<16xf32>
    %53 = vector.shape_cast %52 : vector<16xf32> to vector<16x1xf32>
    %54 = vector.broadcast %53 : vector<16x1xf32> to vector<16x16xf32>
    %55 = arith.subf %51, %54 : vector<16x16xf32>
    %56 = math.exp %55 : vector<16x16xf32>
    %cst_25 = arith.constant dense<0.000000e+00> : vector<16xf32>
    %57 = vector.multi_reduction <add>, %56, %cst_25 [1] : vector<16x16xf32> to vector<16xf32>
    %58 = vector.shape_cast %57 : vector<16xf32> to vector<16x1xf32>
    %59 = arith.truncf %56 : vector<16x16xf32> to vector<16x16xbf16>
    %cst_26 = arith.constant dense<0.000000e+00> : vector<16x8xf32>
    %60 = tpu.matmul %59, %50, %cst_26 {dimension_numbers = #tpu.dot_dimension_numbers<[1], [0], [0], [1], [0, 0, 1, 1], [], []>} : vector<16x16xbf16>, vector<16x8xbf16>, vector<16x8xf32> -> vector<16x8xf32>
    %61 = tpu.reciprocal %58 : vector<16x1xf32> -> vector<16x1xf32>
    %62 = vector.broadcast %61 : vector<16x1xf32> to vector<16x8xf32>
    %63 = arith.mulf %60, %62 : vector<16x8xf32>
    %64 = arith.truncf %63 : vector<16x8xf32> to vector<16x8xbf16>
    %c0_27 = arith.constant 0 : index
    %c16 = arith.constant 16 : index
    %65 = vector.load %arg15[%c0_27, %c16] : memref<16x32xbf16, #tpu.memory_space<vmem>>, vector<16x8xbf16>
    tpu.vector_store %arg15[%c0_27, %c16], %64 {strides = array<i32>} : memref<16x32xbf16, #tpu.memory_space<vmem>>, vector<16x8xbf16>,
    %66 = vector.extract_strided_slice %11 {offsets = [0, 24], sizes = [16, 8], strides = [1, 1]} : vector<16x32xbf16> to vector<16x8xbf16>
    %67 = vector.extract_strided_slice %3 {offsets = [24, 0], sizes = [8, 16], strides = [1, 1]} : vector<32x16xbf16> to vector<8x16xbf16>
    %68 = vector.extract_strided_slice %5 {offsets = [0, 24], sizes = [16, 8], strides = [1, 1]} : vector<16x32xbf16> to vector<16x8xbf16>
    %cst_28 = arith.constant dense<0.000000e+00> : vector<16x16xf32>
    %69 = tpu.matmul %66, %67, %cst_28 {dimension_numbers = #tpu.dot_dimension_numbers<[1], [0], [0], [1], [0, 0, 1, 1], [], []>} : vector<16x8xbf16>, vector<8x16xbf16>, vector<16x16xf32> -> vector<16x16xf32>
    %cst_29 = arith.constant dense<0xFF800000> : vector<16xf32>
    %70 = vector.multi_reduction <maximumf>, %69, %cst_29 [1] : vector<16x16xf32> to vector<16xf32>
    %71 = vector.shape_cast %70 : vector<16xf32> to vector<16x1xf32>
    %72 = vector.broadcast %71 : vector<16x1xf32> to vector<16x16xf32>
    %73 = arith.subf %69, %72 : vector<16x16xf32>
    %74 = math.exp %73 : vector<16x16xf32>
    %cst_30 = arith.constant dense<0.000000e+00> : vector<16xf32>
    %75 = vector.multi_reduction <add>, %74, %cst_30 [1] : vector<16x16xf32> to vector<16xf32>
    %76 = vector.shape_cast %75 : vector<16xf32> to vector<16x1xf32>
    %77 = arith.truncf %74 : vector<16x16xf32> to vector<16x16xbf16>
    %cst_31 = arith.constant dense<0.000000e+00> : vector<16x8xf32>
    %78 = tpu.matmul %77, %68, %cst_31 {dimension_numbers = #tpu.dot_dimension_numbers<[1], [0], [0], [1], [0, 0, 1, 1], [], []>} : vector<16x16xbf16>, vector<16x8xbf16>, vector<16x8xf32> -> vector<16x8xf32>
    %79 = tpu.reciprocal %76 : vector<16x1xf32> -> vector<16x1xf32>
    %80 = vector.broadcast %79 : vector<16x1xf32> to vector<16x8xf32>
    %81 = arith.mulf %78, %80 : vector<16x8xf32>
    %82 = arith.truncf %81 : vector<16x8xf32> to vector<16x8xbf16>
    %c0_32 = arith.constant 0 : index
    %c24 = arith.constant 24 : index
    %83 = vector.load %arg15[%c0_32, %c24] : memref<16x32xbf16, #tpu.memory_space<vmem>>, vector<16x8xbf16>
    tpu.vector_store %arg15[%c0_32, %c24], %82 {strides = array<i32>} : memref<16x32xbf16, #tpu.memory_space<vmem>>, vector<16x8xbf16>,
    %c0_33 = arith.constant 0 : index
    %c0_34 = arith.constant 0 : index
    %84 = vector.load %arg15[%c0_33, %c0_34] : memref<16x32xbf16, #tpu.memory_space<vmem>>, vector<16x32xbf16>
    %c0_35 = arith.constant 0 : index
    %c0_36 = arith.constant 0 : index
    %85 = vector.load %arg7[%c0_35, %c0_36] : memref<32x32xbf16, #tpu.memory_space<vmem>>, vector<32x32xbf16>
    %cst_37 = arith.constant dense<0.000000e+00> : vector<16x32xf32>
    %86 = tpu.matmul %84, %85, %cst_37 {dimension_numbers = #tpu.dot_dimension_numbers<[1], [0], [0], [1], [0, 0, 1, 1], [], []>} : vector<16x32xbf16>, vector<32x32xbf16>, vector<16x32xf32> -> vector<16x32xf32>
    %c0_38 = arith.constant 0 : index
    %c0_39 = arith.constant 0 : index
    %87 = vector.load %arg8[%c0_38, %c0_39] : memref<1x32xf32, #tpu.memory_space<vmem>>, vector<1x32xf32>
    %88 = vector.broadcast %87 : vector<1x32xf32> to vector<16x32xf32>
    %89 = arith.addf %86, %88 : vector<16x32xf32>
    %c0_40 = arith.constant 0 : index
    %c0_41 = arith.constant 0 : index
    %90 = vector.load %arg9[%c0_40, %c0_41] : memref<32x64xbf16, #tpu.memory_space<vmem>>, vector<32x64xbf16>
    %cst_42 = arith.constant dense<0.000000e+00> : vector<16x64xf32>
    %91 = tpu.matmul %1, %90, %cst_42 {dimension_numbers = #tpu.dot_dimension_numbers<[1], [0], [0], [1], [0, 0, 1, 1], [], []>} : vector<16x32xbf16>, vector<32x64xbf16>, vector<16x64xf32> -> vector<16x64xf32>
    %92 = arith.truncf %89 : vector<16x32xf32> to vector<16x32xbf16>
    %c0_43 = arith.constant 0 : index
    %c0_44 = arith.constant 0 : index
    %93 = vector.load %arg10[%c0_43, %c0_44] : memref<32x64xbf16, #tpu.memory_space<vmem>>, vector<32x64xbf16>
    %cst_45 = arith.constant dense<0.000000e+00> : vector<16x64xf32>
    %94 = tpu.matmul %92, %93, %cst_45 {dimension_numbers = #tpu.dot_dimension_numbers<[1], [0], [0], [1], [0, 0, 1, 1], [], []>} : vector<16x32xbf16>, vector<32x64xbf16>, vector<16x64xf32> -> vector<16x64xf32>
    %95 = arith.addf %91, %94 : vector<16x64xf32>
    %c0_46 = arith.constant 0 : index
    %c0_47 = arith.constant 0 : index
    %96 = vector.load %arg11[%c0_46, %c0_47] : memref<1x64xf32, #tpu.memory_space<vmem>>, vector<1x64xf32>
    %97 = vector.broadcast %96 : vector<1x64xf32> to vector<16x64xf32>
    %98 = arith.addf %95, %97 : vector<16x64xf32>
    %cst_48 = arith.constant 0.000000e+00 : f32
    %99 = vector.broadcast %cst_48 : f32 to vector<16x64xf32>
    %100 = arith.maximumf %98, %99 : vector<16x64xf32>
    %101 = arith.truncf %100 : vector<16x64xf32> to vector<16x64xbf16>
    %c0_49 = arith.constant 0 : index
    %c0_50 = arith.constant 0 : index
    %102 = vector.load %arg12[%c0_49, %c0_50] : memref<64x32xbf16, #tpu.memory_space<vmem>>, vector<64x32xbf16>
    %cst_51 = arith.constant dense<0.000000e+00> : vector<16x32xf32>
    %103 = tpu.matmul %101, %102, %cst_51 {dimension_numbers = #tpu.dot_dimension_numbers<[1], [0], [0], [1], [0, 0, 1, 1], [], []>} : vector<16x64xbf16>, vector<64x32xbf16>, vector<16x32xf32> -> vector<16x32xf32>
    %c0_52 = arith.constant 0 : index
    %c0_53 = arith.constant 0 : index
    %104 = vector.load %arg13[%c0_52, %c0_53] : memref<1x32xf32, #tpu.memory_space<vmem>>, vector<1x32xf32>
    %105 = vector.broadcast %104 : vector<1x32xf32> to vector<16x32xf32>
    %106 = arith.addf %103, %105 : vector<16x32xf32>
    %c0_54 = arith.constant 0 : index
    %c0_55 = arith.constant 0 : index
    %c0_56 = arith.constant 0 : index
    %107 = vector.load %arg14[%c0_54, %c0_55, %c0_56] : memref<1x16x32xf32, #tpu.memory_space<vmem>>, vector<1x16x32xf32>
    %108 = vector.shape_cast %107 : vector<1x16x32xf32> to vector<16x32xf32>
    %109 = vector.shape_cast %106 : vector<16x32xf32> to vector<1x16x32xf32>
    tpu.vector_store %arg14[%c0_54, %c0_55, %c0_56], %109 {strides = array<i32>} : memref<1x16x32xf32, #tpu.memory_space<vmem>>, vector<1x16x32xf32>,
    return
  }
  func.func @transform_0(%arg0: i32, %arg1: i32) -> (i32, i32, i32) {
    %c0_i32 = arith.constant 0 : i32
    %c0_i32_0 = arith.constant 0 : i32
    return %arg0, %arg1, %c0_i32 : i32, i32, i32
  }
  func.func @transform_1(%arg0: i32, %arg1: i32) -> (i32, i32, i32) {
    %c0_i32 = arith.constant 0 : i32
    %c0_i32_0 = arith.constant 0 : i32
    %c0_i32_1 = arith.constant 0 : i32
    return %arg0, %c0_i32, %c0_i32_0 : i32, i32, i32
  }
  func.func @transform_2(%arg0: i32, %arg1: i32) -> (i32, i32, i32) {
    %c0_i32 = arith.constant 0 : i32
    %c0_i32_0 = arith.constant 0 : i32
    %c0_i32_1 = arith.constant 0 : i32
    return %arg0, %c0_i32, %c0_i32_0 : i32, i32, i32
  }
  func.func @transform_3(%arg0: i32, %arg1: i32) -> (i32, i32) {
    %c0_i32 = arith.constant 0 : i32
    %c0_i32_0 = arith.constant 0 : i32
    %c0_i32_1 = arith.constant 0 : i32
    return %c0_i32, %c0_i32_0 : i32, i32
  }
  func.func @transform_4(%arg0: i32, %arg1: i32) -> (i32, i32) {
    %c0_i32 = arith.constant 0 : i32
    %c0_i32_0 = arith.constant 0 : i32
    %c0_i32_1 = arith.constant 0 : i32
    return %c0_i32, %c0_i32_0 : i32, i32
  }
  func.func @transform_5(%arg0: i32, %arg1: i32) -> (i32, i32) {
    %c0_i32 = arith.constant 0 : i32
    %c0_i32_0 = arith.constant 0 : i32
    %c0_i32_1 = arith.constant 0 : i32
    return %c0_i32, %c0_i32_0 : i32, i32
  }
  func.func @transform_6(%arg0: i32, %arg1: i32) -> (i32, i32) {
    %c0_i32 = arith.constant 0 : i32
    %c0_i32_0 = arith.constant 0 : i32
    %c0_i32_1 = arith.constant 0 : i32
    return %c0_i32, %c0_i32_0 : i32, i32
  }
  func.func @transform_7(%arg0: i32, %arg1: i32) -> (i32, i32) {
    %c0_i32 = arith.constant 0 : i32
    %c0_i32_0 = arith.constant 0 : i32
    %c0_i32_1 = arith.constant 0 : i32
    return %c0_i32, %c0_i32_0 : i32, i32
  }
  func.func @transform_8(%arg0: i32, %arg1: i32) -> (i32, i32) {
    %c0_i32 = arith.constant 0 : i32
    %c0_i32_0 = arith.constant 0 : i32
    %c0_i32_1 = arith.constant 0 : i32
    return %c0_i32, %c0_i32_0 : i32, i32
  }
  func.func @transform_9(%arg0: i32, %arg1: i32) -> (i32, i32) {
    %c0_i32 = arith.constant 0 : i32
    %c0_i32_0 = arith.constant 0 : i32
    %c0_i32_1 = arith.constant 0 : i32
    return %c0_i32, %c0_i32_0 : i32, i32
  }
  func.func @transform_10(%arg0: i32, %arg1: i32) -> (i32, i32) {
    %c0_i32 = arith.constant 0 : i32
    %c0_i32_0 = arith.constant 0 : i32
    %c0_i32_1 = arith.constant 0 : i32
    return %c0_i32, %c0_i32_0 : i32, i32
  }
  func.func @transform_11(%arg0: i32, %arg1: i32) -> (i32, i32) {
    %c0_i32 = arith.constant 0 : i32
    %c0_i32_0 = arith.constant 0 : i32
    %c0_i32_1 = arith.constant 0 : i32
    return %c0_i32, %c0_i32_0 : i32, i32
  }
  func.func @transform_12(%arg0: i32, %arg1: i32) -> (i32, i32, i32) {
    %c0_i32 = arith.constant 0 : i32
    %c0_i32_0 = arith.constant 0 : i32
    return %arg0, %arg1, %c0_i32 : i32, i32, i32
  }
}

</mosaic_0001>

<bundles_post_ra>
// kernel: tpu_custom_call.1
= control target key start
LH: loop header
LB: loop body
LE: loop exit
PB: predicated region body
PF: predicated region fallthrough
CT: control target
= control target key end

     0   :  { %s2014_s0 = inlined_call_operand.vmem [shape: bf16[2,32,32], index: 0, kind: input, shape index: {}]   ;;  %s2015_s1 = inlined_call_operand.vmem [shape: bf16[2,32,16], index: 1, kind: input, shape index: {}]   ;;  %s2016_s2 = inlined_call_operand.vmem [shape: bf16[2,16,32], index: 2, kind: input, shape index: {}]   ;;  %s2017_s3 = inlined_call_operand.vmem [shape: bf16[32,32], index: 3, kind: input, shape index: {}]   ;;  %s2018_s4 = inlined_call_operand.vmem [shape: f32[1,32], index: 4, kind: input, shape index: {}]   ;;  %s2019_s5 = inlined_call_operand.vmem [shape: bf16[32,32], index: 5, kind: input, shape index: {}]   ;;  %s2020_s6 = inlined_call_operand.vmem [shape: f32[1,32], index: 6, kind: input, shape index: {}]   ;;  %s2021_s7 = inlined_call_operand.vmem [shape: bf16[32,64], index: 7, kind: input, shape index: {}]   ;;  %s2022_s8 = inlined_call_operand.hbm [shape: bf16[32,64], index: 8, kind: input, shape index: {}]   ;;  %s2023_s9 = inlined_call_operand.vmem [shape: f32[1,64], index: 9, kind: input, shape index: {}]   ;;  %s2024_s10 = inlined_call_operand.vmem [shape: bf16[64,32], index: 10, kind: input, shape index: {}]   ;;  %s2025_s11 = inlined_call_operand.vmem [shape: f32[1,32], index: 11, kind: input, shape index: {}]   ;;  %s2026_s12 = inlined_call_operand.hbm [shape: f32[2,32,32], index: 12, kind: output, shape index: {}]  }
   0x1   :  { %2035 = sst [smem:[#allocation15_spill]] %s2014_s0 }
   0x2   :  { %2036 = sst [smem:[#allocation16_spill]] %s2022_s8 }
   0x3   :  { %17 = vsyncpa [#allocation4], 0 }
   0x4   :  { %18 = vsyncpa [#allocation5], 0 }
   0x5   :  { %20 = vsyncpa [#allocation5 + $0x1], 0  ;;  %s1723_s21 = smov 0   ;;  %s1725_s22 = smov 0  }
   0x6   :  { %s1727_s23 = smov 0   ;;  %s1729_s24 = smov 0  }
   0x7   :  { %s1731_s25 = smov 0   ;;  %s1733_s26 = smov 0  }
   0x8   :  { %s1735_s27 = smov 0   ;;  %s1737_s28 = smov 0  }
   0x9 LB: > { %2037 = sst [smem:[#allocation9_spill]] %s1618_s21  ;;  %s1280_s29 = sadd.s32 4294967295, %s1646_s28   ;;  %s1646_s28 = sphi %s1737_s28, %s2065_s28   ;;  %s1642_s27 = sphi %s1735_s27, %s2064_s27   ;;  %s1638_s26 = sphi %s1733_s26, %s2058_s26   ;;  %s1634_s25 = sphi %s1731_s25, %s2063_s25   ;;  %s1630_s24 = sphi %s1729_s24, %s2057_s24   ;;  %s1626_s23 = sphi %s1727_s23, %s2062_s23   ;;  %s1622_s22 = sphi %s1725_s22, %s2061_s22   ;;  %s1618_s21 = sphi %s1723_s21, %s2060_s21  }
   0xa   : > { %2038 = sst [smem:[#allocation10_spill]] %s1638_s26  ;;  %s1281_s30 = sadd.s32 4294967294, %s1646_s28  }
   0xb   : > { %2039 = sst [smem:[#allocation11_spill]] %s1646_s28  ;;  %s35_s13 = sadd.s32 1, %s1638_s26 }
   0xc   : > { %s38_s14 = sadd.s32 1, %s1642_s27  ;;  %p36_p0 = scmp.ge.s32.totalorder %s35_s13, 2 }
   0xd   : > { %s316_s15 = sadd.s32 1, %s1626_s23  ;;  %p326_p1 = scmp.ne.s32.totalorder %s1626_s23, %s1622_s22 }
   0xe   : > { %p327_p2 = scmp.eq.s32.totalorder %s1280_s29, 3  ;;  %s2067_s13 = smov (%p36_p0, %s35_s13), 0 }
   0xf   : > { %2040 = sst [smem:[#allocation12_spill]] %s2067_s13  ;;  %s2069_s14 = smov (!%p36_p0, %s38_s14), %s1642_s27 }
  0x10   : > { %s312_s16 = ssub.s32 %s1638_s26, %s2067_s13  ;;  %p1775_p3 = por %p327_p2, %p326_p1 }
  0x11   : > { %p40_p4 = scmp.ge.s32.totalorder %s2069_s14, 2  ;;  %p332_p5 = scmp.ne.s32.totalorder %s1622_s22, %s1618_s21 }
  0x12   : > { %p333_p6 = scmp.eq.s32.totalorder %s1281_s30, 3  ;;  %p1282_p7 = scmp.ge.s32.totalorder %s1646_s28, 1 }
  0x13   : > { %s2071_s14 = smov (%p40_p4, %s2069_s14), 0  ;;  %p340_p9 = scmp.lt.s32.totalorder %s1646_s28, 5 }
  0x14   : > { %2042 = sst [smem:[#allocation13_spill]] %s2071_s14  ;;  %p1784_p8 = por %p333_p6, %p332_p5 }
  0x15   : > { %s311_s19 = ssub.s32 %s1642_s27, %s2071_s14  ;;  %p1791_p10 = pnand %p1282_p7, %p340_p9 }
  0x16   : > { %s2043_s18 = scalar_select %p1784_p8, 1, 0 }
  0x17   : > { %s313_s20 = sor.u32 %s312_s16, %s311_s19  ;;  %p1795_p12 = scmp.eq.s32.totalorder %s1280_s29, 0 }
  0x18   : > { %2044 = sst [smem:[#allocation14_spill]] %s2043_s18  ;;  %p314_p11 = scmp.eq.s32.totalorder %s313_s20, 0 }
  0x19   : > { %p1397_p13 = pneg %p1791_p10  ;;  %s2047_s8 = sld [smem:[#allocation16_spill]] }
  0x1a   : > { %s1805_s28 = scalar_select %p314_p11, %s1626_s23, %s316_s15  }
  0x1b   : > { %s1648_s16 = smov [#allocation3]   ;;  %p1398_p0 = pnand %p1795_p12, %p1397_p13 }
  0x1c   : > { %s368_s19 = sshll.u32 %s1648_s16, 4  ;;  %s1649_s20 = smov 64   ;;  %s369_s19 = int_to_ptr.vmem [resolvable:$true] %s368_s19 }
  0x1d   : > { %s1650_s29 = smov 4   ;;  %422 = sbr.rel (%p1791_p10) target bundleno = 1444 (0x5a4), region = 68 }
  0x1f   : > { %s366_s18 = sshll.u32 %s2047_s8, 4  ;;  %s367_s18 = int_to_ptr.hbm [resolvable:$true] %s366_s18 }
  0x20   : > { %1400 = dma.hbm_to_vmem [thread:$0]  (!%p1398_p0), %s367_s18, 256, %s369_s19, [#allocation4], %s1649_s20, %s1649_s20, %s1650_s29  }
  0x22   : > { %1609 = dma.done.wait (%p1795_p12), [#allocation4], 256  }
  0x23   : > { %1611 = vsyncadd (%p1795_p12), [#allocation4], 4294967040  ;;  %s1816_s21 = sshll.u32 %s1630_s24, 1  ;;  %p480_p1 = scmp.lt.s32.totalorder %s1634_s25, 1  ;;  %v1379_v0 = vld [vmem:[%s2017_s3 + $0x8] sm:$0xff]  ;;  %v1378_v1 = vld [vmem:[%s2017_s3] sm:$0xff] }
  0x24   : > { %p482_p2 = scmp.lt.s32.totalorder %s1816_s21, 3  ;;  %544 = vmatpush.bf16.msra.mxu0 %v1379_v0  ;;  %s2048_s0 = sld [smem:[#allocation15_spill]]  ;;  %vm534_vm0 = vcmask 261120   ;;  %vm563_vm1 = vcmask 1043456   ;;  %v1482_v8 = vld [vmem:[%s2018_s4] ss:$0 sm:$0xff] }
  0x25   : > { %s1821_s15 = scalar_select %p480_p1, %s1634_s25, 1  ;;  %vm559_vm2 = vcmask 64512   ;;  %vm581_vm3 = vcmask 130048   ;;  %vm656_vm8 = vcmask 60416  }
  0x26   : > { %s483_s13 = scalar_select %p482_p2, %s1816_s21, 3 }
  0x27   : > { %s1289_s18 = sshll.u32 %s1821_s15, 2  ;;  %s1652_s26 = smov 120  }
  0x28   : > { %s485_s30 = sadd.s32 %s1289_s18, %s483_s13  ;;  %545 = vmatpush.bf16.msra.mxu0 %v1378_v1  ;;  %s1374_s13 = sshll.u32 %s1821_s15, 4 }
  0x29   : > { %s1290_s16 = sshll.u32 %s485_s30, 2  ;;  %s1842_s19 = scalar_lea.vmem %s2015_s1, %s1374_s13 }
  0x2a   : > { %s487_s14 = scalar_lea.vmem %s2048_s0, %s1290_s16  ;;  %v503_v3 = vld [vmem:[%s1842_s19] sm:$0xf]  ;;  %v506_v5 = vld [vmem:[%s1842_s19 + $0xc] sm:$0xf]  ;;  %s1651_s16 = smov 104  }
  0x2b   : > { %v1834_v2 = vld [vmem:[%s487_s14] sm:$0xff]  ;;  %v565_v4 = vsel %vm563_vm1, %v503_v3, 0  ;;  %v873_v6 = vsel %vm563_vm1, %v506_v5, 0  ;;  %s1653_s20 = smov 112   ;;  %s1375_s24 = sshll.u32 %s1821_s15, 3 }
  0x2c   : > { %1307 = vmatmul.msk.bf16.vlgmr.msra.gmra.mxu0 %vm534_vm0, %v1834_v2  ;;  %574 = vmatpush.bf16.msra.mxu1 %v565_v4  ;;  %v504_v17 = vld [vmem:[%s1842_s19 + $0x4] sm:$0xf]  ;;  %s498_s18 = scalar_lea.vmem %s2016_s2, %s1375_s24  ;;  %v505_v28 = vld [vmem:[%s1842_s19 + $0x8] sm:$0xf]  ;;  %s2034_s15 = smov 8  }
  0x2d   : > { %882 = vmatpush.bf16.msrb.mxu0 %v873_v6  ;;  %v665_v18 = vsel %vm563_vm1, %v504_v17, 0  ;;  %v1861_v20 = vld [vmem:[%s498_s18] sm:$0xff]  ;;  %v769_v29 = vsel %vm563_vm1, %v505_v28, 0  ;;  %s1655_s30 = smov 16   ;;  %s1656_s19 = smov 24  }
  0x2e   : > { %674 = vmatpush.bf16.msra.mxu3 %v665_v18  ;;  %617 = vmatpush.bf16.msra.mxu2 %v1861_v20 }
  0x32   : > { %778 = vmatpush.bf16.msrb.mxu2 %v769_v29 }
  0xa9   : > { %v547_v7 = vpop.f32.mrf.mxu0 }
  0xaa   : > { %v548_v9 = vadd.f32 %v1482_v8, %v547_v7 }
  0xac   : > { %v552_v11 = vpack.c.bf16 %v548_v9, %v548_v9 }
  0xae   : > { %v556_v14 = vunpack.c.l.b16 %v552_v11 }
  0xb1   : > { %v549_v10 = vpop.f32.mrf.mxu0 }
  0xb2   : > { %v550_v12 = vadd.f32 %v1482_v8, %v549_v10 }
  0xb4   : > { %v553_v13 = vpack.c.bf16 %v550_v12, %v550_v12 }
  0xb6   : > { %v557_v15 = vunpack.c.l.b16 %v553_v13 }
  0xb8   : > { %v558_v16 = vpack.c.b16 %v557_v15, %v556_v14 }
  0xba   : > { %867 = vrot.lane.b32.xlu2 %v558_v16, %s1651_s16  ;;  %659 = vrot.lane.b32.xlu1 %v558_v16, %s1652_s26 }
  0xbb   : > { %1308 = vmatmul.msk.bf16.vlgmr.msra.gmra.mxu1 %vm559_vm2, %v558_v16 }
  0xc2   : > { %763 = vrot.lane.b32.xlu1 %v558_v16, %s1653_s20 }
 0x114   : > { %v868_v19 = vpop.permute.xlu2 %867 }
 0x115   : > { %1318 = vmatmul.msk.bf16.vlgmr.msrb.gmra.mxu0 %vm559_vm2, %v868_v19 }
 0x12c   : > { %v660_v21 = vpop.permute.xlu1 %659 }
 0x12d   : > { %1314 = vmatmul.msk.bf16.vlgmr.msra.gmra.mxu3 %vm559_vm2, %v660_v21 }
 0x134   : > { %v764_v43 = vpop.permute.xlu1 %763 }
 0x138   : > { %v576_v22 = vpop.f32.mrf.mxu1 }
 0x139   : > { %v582_v23 = vsel %vm581_vm3, %v576_v22, -inf }
 0x13a   : > { %583 = vmax.xlane.f32.xlu0 %v582_v23 }
 0x140   : > { %v578_v24 = vpop.f32.mrf.mxu1 }
 0x141   : > { %v585_v25 = vsel %vm581_vm3, %v578_v24, -inf }
 0x142   : > { %586 = vmax.xlane.f32.xlu0 %v585_v25 }
 0x156   : > { %700 = vrot.lane.b32.xlu0 %v1861_v20, %s1652_s26  ;;  %s1568_s26 = scalar_lea.hbm %s2026_s12, 64 }
 0x192   : > { %v884_v26 = vpop.f32.mrf.mxu0 }
 0x193   : > { %v889_v27 = vsel %vm581_vm3, %v884_v26, -inf }
 0x194   : > { %890 = vmax.xlane.f32.xlu2 %v889_v27 }
 0x19a   : > { %v886_v1 = vpop.f32.mrf.mxu0 }
 0x19b   : > { %v892_v3 = vsel %vm581_vm3, %v886_v1, -inf }
 0x1ad   : > { %v584_v30 = vpop.xlane.xlu0 %583 }
 0x1ae   : > { %v588_v32 = vsub.f32 %v576_v22, %v584_v30 }
 0x1b0   : > { %v676_v31 = vpop.f32.mrf.mxu3  ;;  %v590_v34 = vmul.f32 1.442695, %v588_v32 }
 0x1b1   : > { %v681_v33 = vsel %vm581_vm3, %v676_v31, -inf }
 0x1b2   : > { %682 = vmax.xlane.f32.xlu2 %v681_v33  ;;  %1486 = vpow2.f32 %v590_v34 }
 0x1b5   : > { %v587_v35 = vpop.xlane.xlu0 %586 }
 0x1b6   : > { %v589_v36 = vsub.f32 %v578_v24, %v587_v35 }
 0x1b8   : > { %v592_v37 = vmul.f32 1.442695, %v589_v36  ;;  %v678_v38 = vpop.f32.mrf.mxu3  ;;  %v1487_v40 = vpop.eup %1486 }
 0x1b9   : > { %v684_v39 = vsel %vm581_vm3, %v678_v38, -inf  ;;  %v594_v55 = vsel %vm581_vm3, %v1487_v40, 0.0 }
 0x1ba   : > { %1488 = vpow2.f32 %v592_v37  ;;  %685 = vmax.xlane.f32.xlu0 %v684_v39 }
 0x1c0   : > { %v1489_v41 = vpop.eup %1488 }
 0x1c1   : > { %v600_v42 = vpack.c.bf16 %v1489_v41, %v1487_v40  ;;  %v597_v8 = vsel %vm581_vm3, %v1489_v41, 0.0 }
 0x1c3   : > { %1313 = vmatmul.msk.bf16.vlgmr.msra.gmra.mxu2 %vm581_vm3, %v600_v42 }
 0x1c8   : > { %v701_v44 = vpop.permute.xlu0 %700 }
 0x1c9   : > { %713 = vmatpush.bf16.msrb.mxu1 %v701_v44 }
 0x1ca   : > { %804 = vrot.lane.b32.xlu2 %v1861_v20, %s1653_s20 }
 0x1d3   : > { %1316 = vmatmul.msk.bf16.vlgmr.msrb.gmra.mxu2 %vm559_vm2, %v764_v43 }
 0x207   : > { %v891_v45 = vpop.xlane.xlu2 %890 }
 0x208   : > { %v895_v61 = vsub.f32 %v884_v26, %v891_v45 }
 0x20a   : > { %v897_v0 = vmul.f32 1.442695, %v895_v61 }
 0x225   : > { %v683_v46 = vpop.xlane.xlu2 %682 }
 0x226   : > { %v687_v47 = vsub.f32 %v676_v31, %v683_v46 }
 0x228   : > { %v689_v48 = vmul.f32 1.442695, %v687_v47 }
 0x22a   : > { %1490 = vpow2.f32 %v689_v48 }
 0x22d   : > { %v686_v49 = vpop.xlane.xlu0 %685  ;;  %v805_v6 = vpop.permute.xlu2 %804 }
 0x22e   : > { %v688_v50 = vsub.f32 %v678_v38, %v686_v49  ;;  %817 = vmatpush.bf16.msrb.mxu3 %v805_v6 }
 0x230   : > { %v1491_v51 = vpop.eup %1490  ;;  %v691_v52 = vmul.f32 1.442695, %v688_v50 }
 0x231   : > { %v693_v53 = vsel %vm581_vm3, %v1491_v51, 0.0 }
 0x232   : > { %1492 = vpow2.f32 %v691_v52  ;;  %694 = vadd.xlane.f32.xlu2 %v693_v53 }
 0x233   : > { %1494 = vpow2.f32 %v897_v0 }
 0x238   : > { %v1493_v54 = vpop.eup %1492 }
 0x239   : > { %v699_v56 = vpack.c.bf16 %v1493_v54, %v1491_v51  ;;  %v1495_v4 = vpop.eup %1494  ;;  %v696_v7 = vsel %vm581_vm3, %v1493_v54, 0.0 }
 0x23a   : > { %595 = vadd.xlane.f32.xlu2 %v594_v55  ;;  %v901_v5 = vsel %vm581_vm3, %v1495_v4, 0.0 }
 0x23b   : > { %1315 = vmatmul.msk.bf16.vlgmr.msrb.gmra.mxu1 %vm581_vm3, %v699_v56 }
 0x246   : > { %v619_v57 = vpop.f32.mrf.mxu2 }
 0x24e   : > { %v1880_v58 = vpop.f32.mrf.mxu2 }
 0x256   : > { %v780_v59 = vpop.f32.mrf.mxu2 }
 0x257   : > { %v785_v60 = vsel %vm581_vm3, %v780_v59, -inf }
 0x258   : > { %786 = vmax.xlane.f32.xlu1 %v785_v60 }
 0x25e   : > { %v782_v62 = vpop.f32.mrf.mxu2 }
 0x25f   : > { %v788_v63 = vsel %vm581_vm3, %v782_v62, -inf }
 0x260   : > { %789 = vmax.xlane.f32.xlu0 %v788_v63 }
 0x268   : > { %893 = vmax.xlane.f32.xlu0 %v892_v3 }
 0x270   : > { %902 = vadd.xlane.f32.xlu0 %v901_v5 }
 0x271   : > { %908 = vrot.lane.b32.xlu1 %v1861_v20, %s1651_s16 }
 0x29b   : > { %697 = vadd.xlane.f32.xlu1 %v696_v7 }
 0x2a3   : > { %598 = vadd.xlane.f32.xlu1 %v597_v8 }
 0x2a5   : > { %v695_v9 = vpop.xlane.xlu2 %694 }
 0x2a6   : > { %v731_v46 = vand.u32 2147483648, %v695_v9  ;;  %vm725_vm10 = vweird.f32 %v695_v9  ;;  %v729_v47 = vand.u32 2147483647, %v695_v9 }
 0x2a8   : > { %v732_v50 = vor.u32 1.1754944e-38, %v731_v46  ;;  %vm730_vm12 = vcmp.eq.f32.partialorder %v729_v47, 8.507059e+37 }
 0x2ad   : > { %v596_v10 = vpop.xlane.xlu2 %595 }
 0x2ae   : > { %1496 = vrcp.f32 %v596_v10  ;;  %v635_v14 = vand.u32 2147483648, %v596_v10  ;;  %v633_v16 = vand.u32 2147483647, %v596_v10  ;;  %vm629_vm5 = vweird.f32 %v596_v10 }
 0x2b0   : > { %v636_v18 = vor.u32 1.1754944e-38, %v635_v14  ;;  %vm634_vm7 = vcmp.eq.f32.partialorder %v633_v16, 8.507059e+37 }
 0x2b4   : > { %v1497_v11 = vpop.eup %1496 }
 0x2b5   : > { %v625_v12 = vmul.f32 %v1497_v11, %v596_v10  ;;  %vm630_vm4 = vweird.f32 %v1497_v11 }
 0x2b6   : > { %vm631_vm6 = vmor %vm629_vm5, %vm630_vm4 }
 0x2b7   : > { %v626_v13 = vsub.f32 1.0, %v625_v12 }
 0x2b8   : > { %v715_v49 = vpop.f32.mrf.mxu1 }
 0x2b9   : > { %v627_v15 = vmul.f32 %v1497_v11, %v626_v13 }
 0x2bb   : > { %v628_v17 = vadd.f32 %v1497_v11, %v627_v15 }
 0x2bd   : > { %v632_v19 = vsel %vm631_vm6, %v1497_v11, %v628_v17 }
 0x2be   : > { %v637_v20 = vsel %vm634_vm7, %v636_v18, %v632_v19 }
 0x2bf   : > { %v652_v21 = vmul.f32 %v637_v20, %v619_v57 }
 0x2c0   : > { %v717_v5 = vpop.f32.mrf.mxu1 }
 0x2c1   : > { %v654_v22 = vpack.c.bf16 %v652_v21, %v652_v21 }
 0x2c3   : > { %657 = vst.msk [vmem:[#allocation2] sm:$0xf] %vm656_vm8, %v654_v22 }
 0x2cb   : > { %v787_v23 = vpop.xlane.xlu1 %786 }
 0x2cc   : > { %v791_v24 = vsub.f32 %v780_v59, %v787_v23 }
 0x2ce   : > { %v793_v25 = vmul.f32 1.442695, %v791_v24 }
 0x2d0   : > { %1498 = vpow2.f32 %v793_v25 }
 0x2d3   : > { %v790_v26 = vpop.xlane.xlu0 %789 }
 0x2d4   : > { %v792_v27 = vsub.f32 %v782_v62, %v790_v26 }
 0x2d6   : > { %v1499_v28 = vpop.eup %1498  ;;  %v795_v29 = vmul.f32 1.442695, %v792_v27 }
 0x2d7   : > { %v797_v30 = vsel %vm581_vm3, %v1499_v28, 0.0 }
 0x2d8   : > { %1500 = vpow2.f32 %v795_v29  ;;  %798 = vadd.xlane.f32.xlu0 %v797_v30 }
 0x2d9   : > { %1502 = vrcp.f32 %v695_v9 }
 0x2db   : > { %v894_v31 = vpop.xlane.xlu0 %893 }
 0x2dc   : > { %v896_v32 = vsub.f32 %v886_v1, %v894_v31 }
 0x2de   : > { %v1501_v33 = vpop.eup %1500  ;;  %v899_v34 = vmul.f32 1.442695, %v896_v32 }
 0x2df   : > { %v1503_v35 = vpop.eup %1502  ;;  %v800_v36 = vsel %vm581_vm3, %v1501_v33, 0.0  ;;  %v803_v37 = vpack.c.bf16 %v1501_v33, %v1499_v28 }
 0x2e0   : > { %1504 = vpow2.f32 %v899_v34  ;;  %801 = vadd.xlane.f32.xlu0 %v800_v36  ;;  %v721_v38 = vmul.f32 %v1503_v35, %v695_v9  ;;  %vm726_vm9 = vweird.f32 %v1503_v35 }
 0x2e1   : > { %1317 = vmatmul.msk.bf16.vlgmr.msrb.gmra.mxu3 %vm581_vm3, %v803_v37  ;;  %vm727_vm11 = vmor %vm725_vm10, %vm726_vm9 }
 0x2e2   : > { %v722_v41 = vsub.f32 1.0, %v721_v38 }
 0x2e3   : > { %v909_v39 = vpop.permute.xlu1 %908  ;;  %v1900_v19 = vpop.xlane.xlu0 %902 }
 0x2e4   : > { %921 = vmatpush.bf16.msra.mxu1 %v909_v39  ;;  %v723_v44 = vmul.f32 %v1503_v35, %v722_v41 }
 0x2e6   : > { %v1505_v40 = vpop.eup %1504  ;;  %v724_v45 = vadd.f32 %v1503_v35, %v723_v44 }
 0x2e7   : > { %v907_v42 = vpack.c.bf16 %v1505_v40, %v1495_v4  ;;  %v904_v43 = vsel %vm581_vm3, %v1505_v40, 0.0 }
 0x2e8   : > { %905 = vadd.xlane.f32.xlu0 %v904_v43  ;;  %v728_v48 = vsel %vm727_vm11, %v1503_v35, %v724_v45 }
 0x2e9   : > { %1319 = vmatmul.msk.bf16.vlgmr.msra.gmra.mxu1 %vm581_vm3, %v907_v42  ;;  %v733_v51 = vsel %vm730_vm12, %v732_v50, %v728_v48 }
 0x2ea   : > { %v748_v52 = vmul.f32 %v733_v51, %v715_v49 }
 0x2ec   : > { %v750_v53 = vpack.c.bf16 %v748_v52, %v748_v52 }
 0x2fc   : > { %754 = vrot.lane.b32.xlu0 %v750_v53, %s2034_s15 }
 0x30e   : > { %v698_v54 = vpop.xlane.xlu1 %697 }
 0x30f   : > { %1506 = vrcp.f32 %v698_v54  ;;  %v745_v60 = vand.u32 2147483648, %v698_v54  ;;  %v743_v62 = vand.u32 2147483647, %v698_v54  ;;  %vm739_vm14 = vweird.f32 %v698_v54 }
 0x311   : > { %v746_v1 = vor.u32 1.1754944e-38, %v745_v60  ;;  %vm744_vm1 = vcmp.eq.f32.partialorder %v743_v62, 8.507059e+37 }
 0x315   : > { %v1507_v55 = vpop.eup %1506 }
 0x316   : > { %v735_v56 = vmul.f32 %v1507_v55, %v698_v54  ;;  %v599_v57 = vpop.xlane.xlu1 %598  ;;  %vm740_vm13 = vweird.f32 %v1507_v55 }
 0x317   : > { %1508 = vrcp.f32 %v599_v57  ;;  %vm741_vm15 = vmor %vm739_vm14, %vm740_vm13  ;;  %v649_v9 = vand.u32 2147483648, %v599_v57  ;;  %v647_v11 = vand.u32 2147483647, %v599_v57  ;;  %vm643_vm3 = vweird.f32 %v599_v57 }
 0x318   : > { %v736_v59 = vsub.f32 1.0, %v735_v56 }
 0x319   : > { %v650_v14 = vor.u32 1.1754944e-38, %v649_v9  ;;  %vm648_vm5 = vcmp.eq.f32.partialorder %v647_v11, 8.507059e+37 }
 0x31a   : > { %v737_v61 = vmul.f32 %v1507_v55, %v736_v59 }
 0x31c   : > { %v738_v63 = vadd.f32 %v1507_v55, %v737_v61  ;;  %v939_v61 = vand.u32 2147483648, %v1900_v19 }
 0x31d   : > { %v1509_v0 = vpop.eup %1508 }
 0x31e   : > { %v639_v3 = vmul.f32 %v1509_v0, %v599_v57  ;;  %v742_v4 = vsel %vm741_vm15, %v1507_v55, %v738_v63  ;;  %vm644_vm2 = vweird.f32 %v1509_v0 }
 0x31f   : > { %v747_v6 = vsel %vm744_vm1, %v746_v1, %v742_v4  ;;  %vm645_vm4 = vmor %vm643_vm3, %vm644_vm2  ;;  %vm760_vm3 = vcmask 126016   ;;  %v937_v1 = vand.u32 2147483647, %v1900_v19 }
 0x320   : > { %v640_v7 = vsub.f32 1.0, %v639_v3  ;;  %v749_v8 = vmul.f32 %v747_v6, %v717_v5 }
 0x322   : > { %v641_v10 = vmul.f32 %v1509_v0, %v640_v7  ;;  %v751_v12 = vpack.c.bf16 %v749_v8, %v749_v8 }
 0x324   : > { %v642_v13 = vadd.f32 %v1509_v0, %v641_v10  ;;  %756 = vrot.lane.b32.xlu2 %v751_v12, %s2034_s15  ;;  %v940_v10 = vor.u32 1.1754944e-38, %v939_v61 }
 0x326   : > { %v646_v15 = vsel %vm645_vm4, %v1509_v0, %v642_v13  ;;  %vm933_vm4 = vweird.f32 %v1900_v19 }
 0x327   : > { %v651_v16 = vsel %vm648_vm5, %v650_v14, %v646_v15 }
 0x328   : > { %v653_v17 = vmul.f32 %v651_v16, %v1880_v58  ;;  %v1382_v16 = vld [vmem:[%s2019_s5 + $0x8] sm:$0xff] }
 0x329   : > { %1007 = vmatpush.bf16.msra.mxu2 %v1382_v16 }
 0x32a   : > { %v655_v18 = vpack.c.bf16 %v653_v17, %v653_v17  ;;  %v1381_v17 = vld [vmem:[%s2019_s5] sm:$0xff] }
 0x32c   : > { %658 = vst.msk [vmem:[#allocation2 + $0x4] sm:$0xf] %vm656_vm8, %v655_v18  ;;  %v1386_v18 = vld [vmem:[#allocation3 + $0x8] sm:$0xff] }
 0x32d   : > { %1008 = vmatpush.bf16.msra.mxu2 %v1381_v17  ;;  %1045 = vmatpush.bf16.msra.mxu3 %v1386_v18 }
 0x34b   : > { %v799_v20 = vpop.xlane.xlu0 %798 }
 0x34c   : > { %1510 = vrcp.f32 %v799_v20  ;;  %v835_v32 = vand.u32 2147483648, %v799_v20  ;;  %vm829_vm7 = vweird.f32 %v799_v20  ;;  %v833_v33 = vand.u32 2147483647, %v799_v20 }
 0x34e   : > { %v836_v38 = vor.u32 1.1754944e-38, %v835_v32  ;;  %vm834_vm9 = vcmp.eq.f32.partialorder %v833_v33, 8.507059e+37  ;;  %v1390_v32 = vld [vmem:[%s2024_s10 + $0x18] sm:$0xff]  ;;  %v1388_v33 = vld [vmem:[%s2024_s10 + $0x8] sm:$0xff] }
 0x34f   : > { %1132 = vmatpush.bf16.msrb.mxu1 %v1390_v32 }
 0x352   : > { %v1511_v21 = vpop.eup %1510 }
 0x353   : > { %v825_v22 = vmul.f32 %v1511_v21, %v799_v20  ;;  %v802_v23 = vpop.xlane.xlu0 %801  ;;  %vm830_vm6 = vweird.f32 %v1511_v21 }
 0x354   : > { %1512 = vrcp.f32 %v802_v23  ;;  %vm831_vm8 = vmor %vm829_vm7, %vm830_vm6  ;;  %vm843_vm11 = vweird.f32 %v802_v23  ;;  %v849_v47 = vand.u32 2147483648, %v802_v23  ;;  %v847_v49 = vand.u32 2147483647, %v802_v23 }
 0x355   : > { %1514 = vrcp.f32 %v1900_v19  ;;  %v826_v24 = vsub.f32 1.0, %v825_v22  ;;  %vm938_vm7 = vcmp.eq.f32.partialorder %v937_v1, 8.507059e+37 }
 0x356   : > { %v850_v56 = vor.u32 1.1754944e-38, %v849_v47  ;;  %vm848_vm2 = vcmp.eq.f32.partialorder %v847_v49, 8.507059e+37  ;;  %v1485_v47 = vld [vmem:[%s2025_s11] ss:$0 sm:$0xff] }
 0x357   : > { %v827_v25 = vmul.f32 %v1511_v21, %v826_v24  ;;  %v1384_v24 = vld [vmem:[%s2021_s7 + $0x8] sm:$0xff] }
 0x358   : > { %1071 = vmatpush.bf16.msra.mxu0 %v1384_v24 }
 0x359   : > { %v828_v30 = vadd.f32 %v1511_v21, %v827_v25  ;;  %v1385_v25 = vld [vmem:[#allocation3] sm:$0xff] }
 0x35a   : > { %v1513_v26 = vpop.eup %1512  ;;  %1046 = vmatpush.bf16.msra.mxu3 %v1385_v25 }
 0x35b   : > { %v1903_v27 = vpop.eup %1514  ;;  %v839_v28 = vmul.f32 %v1513_v26, %v802_v23  ;;  %v906_v58 = vpop.xlane.xlu0 %905  ;;  %v832_v34 = vsel %vm831_vm8, %v1511_v21, %v828_v30  ;;  %vm844_vm10 = vweird.f32 %v1513_v26  ;;  %vm864_vm8 = vcmask 191616  }
 0x35c   : > { %1516 = vrcp.f32 %v906_v58  ;;  %v929_v31 = vmul.f32 %v1903_v27, %v1900_v19  ;;  %v837_v41 = vsel %vm834_vm9, %v836_v38, %v832_v34  ;;  %vm1908_vm13 = vmor %vm843_vm11, %vm844_vm10  ;;  %v953_v52 = vand.u32 2147483648, %v906_v58  ;;  %v1387_v34 = vld [vmem:[%s2024_s10] sm:$0xff] }
 0x35d   : > { %v840_v29 = vsub.f32 1.0, %v839_v28  ;;  %vm947_vm14 = vweird.f32 %v906_v58  ;;  %v951_v55 = vand.u32 2147483647, %v906_v58  ;;  %vm934_vm1 = vweird.f32 %v1903_v27  ;;  %v1483_v28 = vld [vmem:[%s2020_s6] ss:$0 sm:$0xff] }
 0x35e   : > { %v930_v37 = vsub.f32 1.0, %v929_v31  ;;  %v954_v0 = vor.u32 1.1754944e-38, %v953_v52  ;;  %vm935_vm6 = vmor %vm933_vm4, %vm934_vm1  ;;  %vm968_vm9 = vcmask 257216   ;;  %v1484_v38 = vld [vmem:[%s2023_s9] ss:$0 sm:$0xff]  ;;  %vm1124_vm10 = vcmask 523264  }
 0x35f   : > { %v841_v35 = vmul.f32 %v1513_v26, %v840_v29  ;;  %vm952_vm5 = vcmp.eq.f32.partialorder %v951_v55, 8.507059e+37 }
 0x360   : > { %v931_v46 = vmul.f32 %v1903_v27, %v930_v37 }
 0x361   : > { %v842_v44 = vadd.f32 %v1513_v26, %v841_v35 }
 0x362   : > { %v1517_v36 = vpop.eup %1516  ;;  %v932_v59 = vadd.f32 %v1903_v27, %v931_v46 }
 0x363   : > { %v943_v39 = vmul.f32 %v1517_v36, %v906_v58  ;;  %vm948_vm12 = vweird.f32 %v1517_v36  ;;  %v846_v53 = vsel %vm1908_vm13, %v1513_v26, %v842_v44  ;;  %v1383_v26 = vld [vmem:[%s2021_s7] sm:$0xff] }
 0x364   : > { %v819_v40 = vpop.f32.mrf.mxu3  ;;  %vm1915_vm15 = vmor %vm947_vm14, %vm948_vm12  ;;  %v851_v63 = vsel %vm848_vm2, %v850_v56, %v846_v53  ;;  %v936_v7 = vsel %vm935_vm6, %v1903_v27, %v932_v59  ;;  %1072 = vmatpush.bf16.msra.mxu0 %v1383_v26 }
 0x365   : > { %v944_v42 = vsub.f32 1.0, %v943_v39  ;;  %v852_v43 = vmul.f32 %v837_v41, %v819_v40  ;;  %v941_v12 = vsel %vm938_vm7, %v940_v10, %v936_v7 }
 0x366   : > { %v923_v45 = vpop.f32.mrf.mxu1 }
 0x367   : > { %v854_v48 = vpack.c.bf16 %v852_v43, %v852_v43  ;;  %v945_v50 = vmul.f32 %v1517_v36, %v944_v42  ;;  %v956_v13 = vmul.f32 %v941_v12, %v923_v45  ;;  %1350 = vmatmul.msk.bf16.vlgmr.msra.gmra.mxu0 %vm534_vm0, %v1834_v2  ;;  %v1389_v2 = vld [vmem:[%s2024_s10 + $0x10] sm:$0xff] }
 0x368   : > { %1133 = vmatpush.bf16.msrb.mxu1 %v1389_v2 }
 0x369   : > { %858 = vrot.lane.b32.xlu1 %v854_v48, %s1655_s30  ;;  %v946_v54 = vadd.f32 %v1517_v36, %v945_v50  ;;  %v958_v14 = vpack.c.bf16 %v956_v13, %v956_v13 }
 0x36b   : > { %v950_v60 = vsel %vm1915_vm15, %v1517_v36, %v946_v54 }
 0x36c   : > { %v821_v62 = vpop.f32.mrf.mxu3  ;;  %v955_v5 = vsel %vm952_vm5, %v954_v0, %v950_v60  ;;  %1134 = vmatpush.bf16.msrb.mxu1 %v1388_v33 }
 0x36d   : > { %v853_v3 = vmul.f32 %v851_v63, %v821_v62 }
 0x36e   : > { %v925_v4 = vpop.f32.mrf.mxu1  ;;  %v755_v6 = vpop.permute.xlu0 %754 }
 0x36f   : > { %v855_v8 = vpack.c.bf16 %v853_v3, %v853_v3  ;;  %v957_v9 = vmul.f32 %v955_v5, %v925_v4  ;;  %761 = vst.msk [vmem:[#allocation2] sm:$0xf] %vm760_vm3, %v755_v6 }
 0x370   : > { %1135 = vmatpush.bf16.msrb.mxu1 %v1387_v34 }
 0x371   : > { %v959_v11 = vpack.c.bf16 %v957_v9, %v957_v9  ;;  %860 = vrot.lane.b32.xlu0 %v855_v8, %s1655_s30  ;;  %s1370_s30 = sshll.u32 %s1634_s25, 2 }
 0x372   : > { %s1156_s8 = sadd.s32 %s1370_s30, %s1816_s21 }
 0x373   : > { %964 = vrot.lane.b32.xlu2 %v959_v11, %s1656_s19  ;;  %s1371_s20 = sshll.u32 %s1156_s8, 3 }
 0x374   : > { %s1158_s13 = scalar_lea.hbm %s2026_s12, %s1371_s20 }
 0x375   : > { %s1161_s15 = sshll.u32 %s1158_s13, 4  ;;  %s1162_s15 = int_to_ptr.hbm [resolvable:$true] %s1161_s15 }
 0x376   : > { %s1562_s30 = sshra.s32 %s1162_s15, 4  ;;  %s1563_s30 = int_to_ptr.hbm [resolvable:$true] %s1562_s30 }
 0x377   : > { %s1564_s8 = scalar_lea.hbm %s1563_s30, 16  ;;  %p1569_p7 = scmp.lt.s32.totalorder %s1563_s30, %s2026_s12 }
 0x378   : > { %p1565_p4 = scmp.ne.s32.totalorder %s1563_s30, %s1564_s8  ;;  %p1570_p9 = scmp.lt.s32.totalorder %s1568_s26, %s1564_s8 }
 0x379   : > { %962 = vrot.lane.b32.xlu0 %v958_v14, %s1656_s19  ;;  %s476_s19 = sand.u32 1, %s1622_s22  }
 0x37a   : > { %s1287_s14 = sshll.u32 %s476_s19, 4  ;;  %s1145_s21 = scalar_lea.sflag [#allocation5], %s476_s19 }
 0x37b   : > { %s478_s18 = scalar_lea.vmem [#allocation6], %s1287_s14  ;;  %p1566_p5 = pnand %p1565_p4, %p1775_p3 }
 0x37c   : > { %s1159_s25 = sshll.u32 %s478_s18, 4  ;;  %p1571_p10 = por %p1570_p9, %p1569_p7  ;;  %s1160_s25 = int_to_ptr.vmem [resolvable:$true] %s1159_s25 }
 0x37d   : > { %p1567_p6 = pneg %p1566_p5 }
 0x37e   : > { %v757_v15 = vpop.permute.xlu2 %756 }
 0x37f   : > { %762 = vst.msk [vmem:[#allocation2 + $0x4] sm:$0xf] %vm760_vm3, %v757_v15  ;;  %p1572_p11 = pnand %p1571_p10, %p1567_p6 }
 0x3cd   : > { %v965_v21 = vpop.permute.xlu2 %964 }
 0x3db   : > { %v859_v19 = vpop.permute.xlu1 %858 }
 0x3dc   : > { %865 = vst.msk [vmem:[#allocation2] sm:$0xf] %vm864_vm8, %v859_v19 }
 0x3e3   : > { %v861_v20 = vpop.permute.xlu0 %860 }
 0x3e4   : > { %866 = vst.msk [vmem:[#allocation2 + $0x4] sm:$0xf] %vm864_vm8, %v861_v20  ;;  %v1074_v35 = vpop.f32.mrf.mxu0 }
 0x3e5   : > { %970 = vst.msk [vmem:[#allocation2 + $0x4] sm:$0xf] %vm968_vm9, %v965_v21 }
 0x3eb   : > { %v963_v22 = vpop.permute.xlu0 %962 }
 0x3ec   : > { %969 = vst.msk [vmem:[#allocation2] sm:$0xf] %vm968_vm9, %v963_v22  ;;  %v1076_v39 = vpop.f32.mrf.mxu0 }
 0x3f3   : > { %v1380_v23 = vld [vmem:[#allocation2] sm:$0xff] }
 0x3f4   : > { %1332 = vmatmul.msk.bf16.vlgmr.msra.gmra.mxu2 %vm534_vm0, %v1380_v23 }
 0x477   : > { %v1010_v27 = vpop.f32.mrf.mxu2 }
 0x478   : > { %v1011_v29 = vadd.f32 %v1483_v28, %v1010_v27 }
 0x47f   : > { %v1012_v58 = vpop.f32.mrf.mxu2 }
 0x480   : > { %v1013_v30 = vadd.f32 %v1483_v28, %v1012_v58 }
 0x482   : > { %v1019_v31 = vpack.c.bf16 %v1013_v30, %v1011_v29 }
 0x484   : > { %1341 = vmatmul.msk.bf16.vlgmr.msra.gmra.mxu3 %vm534_vm0, %v1019_v31 }
 0x507   : > { %v1048_v36 = vpop.f32.mrf.mxu3 }
 0x508   : > { %v1075_v37 = vadd.f32 %v1074_v35, %v1048_v36 }
 0x50a   : > { %v1083_v41 = vadd.f32 %v1484_v38, %v1075_v37 }
 0x50c   : > { %v1085_v44 = vmax.f32 %v1083_v41, 0.0 }
 0x50f   : > { %v1050_v40 = vpop.f32.mrf.mxu3 }
 0x510   : > { %v1077_v42 = vadd.f32 %v1076_v39, %v1050_v40 }
 0x512   : > { %v1084_v43 = vadd.f32 %v1484_v38, %v1077_v42 }
 0x514   : > { %v1086_v45 = vmax.f32 %v1084_v43, 0.0 }
 0x516   : > { %v1087_v46 = vpack.c.bf16 %v1086_v45, %v1085_v44 }
 0x518   : > { %1367 = vmatmul.msk.bf16.vlgmr.msrb.gmra.mxu1 %vm1124_vm10, %v1087_v46 }
 0x595   : > { %v1137_v48 = vpop.f32.mrf.mxu1 }
 0x596   : > { %v1138_v49 = vadd.f32 %v1485_v47, %v1137_v48 }
 0x598   : > { %1142 = vst.msk [vmem:[%s478_s18] sm:$0xff] %vm534_vm0, %v1138_v49 }
 0x59d   : > { %v1139_v50 = vpop.f32.mrf.mxu1 }
 0x59e   : > { %v1140_v51 = vadd.f32 %v1485_v47, %v1139_v50 }
 0x5a0   : > { %1143 = vst.msk [vmem:[%s478_s18 + $0x8] sm:$0xff] %vm534_vm0, %v1140_v51 }
 0x5a1   : > { %1575 = shalt.err (!%p1572_p11)
}
 0x5a2   : > { %s1657_s19 = smov 128   ;;  %s2053_s29 = smov 8  }
 0x5a3   : > { %1395 = dma.vmem_to_hbm [thread:$0]  (%p1775_p3), %s1160_s25, 256, %s1162_s15, %s1145_s21, %s1657_s19, %s1657_s19, %s2053_s29  }
 0x5a4 PF: > { %s2054_s13 = sld [smem:[#allocation11_spill]] }
 0x5a5   : > { %s2055_s18 = sld [smem:[#allocation9_spill]] }
 0x5aa   : > { %p1407_p12 = scmp.ge.s32.totalorder %s2054_s13, 2 }
 0x5ab   : > { %s1176_s16 = sand.u32 1, %s2055_s18  }
 0x5ac   : > { %p1402_p13 = pnand %p1407_p12, %p1784_p8  ;;  %s1177_s14 = scalar_lea.sflag [#allocation5], %s1176_s16 }
 0x5ae   : > { %p1403_p0 = pneg %p1402_p13 }
 0x5b0   : > { %1613 = dma.done.wait (%p1403_p0), %s1177_s14, 256  }
 0x5b1   : > { %1615 = vsyncadd (%p1403_p0), %s1177_s14, 4294967040  ;;  %s26_s30 = sadd.s32 1, %s2054_s13   ;;  %s2057_s24 = sld [smem:[#allocation10_spill]] }
 0x5b2   : > { %p23_p1 = scmp.ge.s32.totalorder %s26_s30, 6   ;;  %s2058_s26 = sld [smem:[#allocation12_spill]] }
 0x5b3   : > { %s2059_s17 = sld [smem:[#allocation13_spill]]  ;;  %s2060_s21 = smov %s1622_s22 }
 0x5b4   : > { %s2061_s22 = smov %s1626_s23  ;;  %s2062_s23 = smov %s1805_s28 }
 0x5b5   : > { %s2063_s25 = smov %s1642_s27  ;;  %s2065_s28 = smov %s26_s30 }
 0x5b6   :  { %25 = sbr.rel (!%p23_p1) target bundleno = 9 (0x9), region = 114 }
 0x5b9   : > { %s2064_s27 = smov %s2059_s17 }
 0x5bb   :  { %1183 = vsyncpa [#allocation4], 1 }
 0x5bc   :  { %1185 = vsyncpa [#allocation4 + $0x1], 1 }
 0x5bd   :  { %1186 = vsyncpa [#allocation5], 1 }
 0x5be   :  { %1188 = vsyncpa [#allocation5 + $0x1], 1 }

</bundles_post_ra>
